<compile_context>
chip_gen: v7x
topology: tpu7x:2x2x1
jax: 0.10.0
libtpu: 0.0.40
codegen_flags: <defaults>
</compile_context>

<pallas_src>
import jax
import jax.numpy as jnp
from jax.experimental import pallas as pl
from jax.experimental.pallas import tpu as pltpu


NEG_BIG = -1e30  # bias for padded class lanes -> exp() underflows to 0.


def _round_up(x, m):
    return (x + m - 1) // m * m


def _choose_tm(B, Dp, n_pad, budget_bytes=24 << 20):
    """Batch-tile size: as large as a ~24 MiB stream budget allows (f32 input
    tile + bf16 output tile, both double-buffered), capped at 2048 and rounded
    to a multiple of 16 (bf16 sublane packing).  For multi-step grids, force an
    even number of steps so v7x can shard them across its two TensorCores."""
    row_bytes = 2 * (Dp * 4 + n_pad * 2)          # double-buffered x(f32) + out(bf16)
    cap = (budget_bytes // row_bytes) // 16 * 16
    cap = max(16, min(2048, cap))
    if B <= cap:
        return _round_up(max(B, 16), 16)
    steps = pl.cdiv(B, cap)
    if steps % 2:                                  # even #steps -> both v7x TCs busy
        steps += 1
    return _round_up(pl.cdiv(B, steps), 16)


# --------------------------------------------------------------------------
# Kernel
# --------------------------------------------------------------------------
def mlp_kernel(x_ref,
               w1_ref, t1_ref,
               w2_ref, t2_ref,
               w3_ref, t3_ref,
               w4_ref, b4_ref,
               o_ref):
    """One batch-tile of the full MLP: 4 bf16 matmuls (f32 acc), folded
    bias+BN shift, ReLU, softmax.  Weights are full VMEM-resident blocks."""

    def layer(h_bf16, w_ref, t_ref):
        z = jnp.dot(h_bf16, w_ref[...], preferred_element_type=jnp.float32)
        z = jnp.maximum(z + t_ref[...], 0.0)       # folded bias+BN shift, ReLU
        return z.astype(jnp.bfloat16)              # dropout = identity (eval)

    h = x_ref[...].astype(jnp.bfloat16)            # flatten+cast fused on-chip
    h = layer(h, w1_ref, t1_ref)                   # fc1 + bn1 + relu
    h = layer(h, w2_ref, t2_ref)                   # fc2 + bn2 + relu
    h = layer(h, w3_ref, t3_ref)                   # fc3 + bn3 + relu (padded to 128)

    logits = jnp.dot(h, w4_ref[...], preferred_element_type=jnp.float32) + b4_ref[...]

    # softmax over the (padded-to-128) class dim; padded lanes have logit -1e30
    m = jnp.max(logits, axis=1, keepdims=True)
    e = jnp.exp(logits - m)
    p = e * pl.reciprocal(jnp.sum(e, axis=1, keepdims=True), approx=True)
    o_ref[...] = p.astype(o_ref.dtype)


# --------------------------------------------------------------------------
# Wrapper
# --------------------------------------------------------------------------
def mlp_forward(x_nchw, folded, *, tm=None):
    """Flatten NCHW input (free view, stays f32), tile the batch, run the
    Pallas kernel, slice back to (B, num_classes)."""
    B = x_nchw.shape[0]
    x_flat = x_nchw.reshape(B, -1)                 # nn.Flatten(); no dtype cast here
    D = x_flat.shape[1]
    Dp = folded["w1"].shape[0]
    if Dp != D:                                    # feature padding (exact: zeros)
        x_flat = jnp.pad(x_flat, ((0, 0), (0, Dp - D)))

    n_pad = folded["w4"].shape[1]                  # 128 (padded classes)
    num_classes = folded["num_classes"]

    if tm is None:
        tm = _choose_tm(B, Dp, n_pad)
    B_pad = _round_up(B, tm)
    if B_pad != B:
        x_flat = jnp.pad(x_flat, ((0, B_pad - B), (0, 0)))

    def resident(shape):
        # Constant index_map -> weight block stays in VMEM across grid steps.
        return pl.BlockSpec(shape, lambda i: (0, 0))

    out = pl.pallas_call(
        mlp_kernel,
        out_shape=jax.ShapeDtypeStruct((B_pad, n_pad), jnp.bfloat16),
        grid_spec=pltpu.PrefetchScalarGridSpec(
            num_scalar_prefetch=0,
            grid=(B_pad // tm,),
            in_specs=[
                pl.BlockSpec((tm, Dp), lambda i: (i, 0)),
                resident(folded["w1"].shape), resident(folded["t1"].shape),
                resident(folded["w2"].shape), resident(folded["t2"].shape),
                resident(folded["w3"].shape), resident(folded["t3"].shape),
                resident(folded["w4"].shape), resident(folded["b4"].shape),
            ],
            out_specs=pl.BlockSpec((tm, n_pad), lambda i: (i, 0)),
        ),
        compiler_params=pltpu.CompilerParams(
            dimension_semantics=("parallel",),     # batch axis: v7x 2-TC sharding
            vmem_limit_bytes=32 * 1024 * 1024,     # lift v5e's 16 MiB scoped default
        ),
    )(x_flat,
      folded["w1"], folded["t1"],
      folded["w2"], folded["t2"],
      folded["w3"], folded["t3"],
      folded["w4"], folded["b4"])

    return out[:B, :num_classes]


# --------------------------------------------------------------------------
# Parameter construction (raw, PyTorch-like) and kernel-ready folding
# --------------------------------------------------------------------------
def make_params(key, input_size, hidden_sizes, num_classes):
    """Deterministic synthetic parameters matching the nn.Module's shapes.
    Weights stored (in_features, out_features) so y = x @ W + b."""
    sizes = [input_size] + list(hidden_sizes) + [num_classes]
    raw = {}
    keys = jax.random.split(key, 24)
    ki = 0
    for layer in range(4):
        fan_in, fan_out = sizes[layer], sizes[layer + 1]
        bound = 1.0 / jnp.sqrt(fan_in)
        raw[f"w{layer+1}"] = jax.random.uniform(keys[ki], (fan_in, fan_out),
                                                jnp.float32, -bound, bound); ki += 1
        raw[f"b{layer+1}"] = jax.random.uniform(keys[ki], (fan_out,),
                                                jnp.float32, -bound, bound); ki += 1
        if layer < 3:  # bn1..bn3 running stats (eval mode)
            raw[f"gamma{layer+1}"] = 1.0 + 0.1 * jax.random.normal(keys[ki], (fan_out,)); ki += 1
            raw[f"beta{layer+1}"] = 0.1 * jax.random.normal(keys[ki], (fan_out,)); ki += 1
            raw[f"mean{layer+1}"] = 0.05 * jax.random.normal(keys[ki], (fan_out,)); ki += 1
            raw[f"var{layer+1}"] = jnp.abs(1.0 + 0.1 * jax.random.normal(keys[ki], (fan_out,))); ki += 1
    return raw


def fold_params(raw, eps=1e-5, lane=128):
    """Fold BN scale into weight columns, bias+BN into a per-feature shift,
    cast weights to bf16, pad every feature dim to 128 lanes."""
    sizes = [raw["w1"].shape[0]] + [raw[f"w{i}"].shape[1] for i in (1, 2, 3, 4)]
    padded = [_round_up(s, lane) for s in sizes]
    folded = {"num_classes": sizes[4]}
    for i in (1, 2, 3):
        w, b = raw[f"w{i}"], raw[f"b{i}"]
        s = raw[f"gamma{i}"] / jnp.sqrt(raw[f"var{i}"] + eps)
        t = raw[f"beta{i}"] + (b - raw[f"mean{i}"]) * s     # bias+BN shift
        w = w * s[None, :]                                  # BN scale folded into W
        rp, cp = padded[i - 1] - w.shape[0], padded[i] - w.shape[1]
        folded[f"w{i}"] = jnp.pad(w, ((0, rp), (0, cp))).astype(jnp.bfloat16)
        folded[f"t{i}"] = jnp.pad(t.reshape(1, -1), ((0, 0), (0, cp))).astype(jnp.float32)
    w4, b4 = raw["w4"], raw["b4"]
    rp, cp = padded[3] - w4.shape[0], padded[4] - w4.shape[1]
    folded["w4"] = jnp.pad(w4, ((0, rp), (0, cp))).astype(jnp.bfloat16)
    folded["b4"] = jnp.pad(b4.reshape(1, -1), ((0, 0), (0, cp)),
                           constant_values=NEG_BIG).astype(jnp.float32)
    return folded


# --------------------------------------------------------------------------
# References
# --------------------------------------------------------------------------
def mlp_reference_matched(x_nchw, folded):
    """Pure-JAX reference with the SAME bf16/padded/folded numerics."""
    h = x_nchw.reshape(x_nchw.shape[0], -1)
    Dp = folded["w1"].shape[0]
    if h.shape[1] != Dp:
        h = jnp.pad(h, ((0, 0), (0, Dp - h.shape[1])))
    h = h.astype(jnp.bfloat16)
    for i in (1, 2, 3):
        z = jnp.dot(h, folded[f"w{i}"], preferred_element_type=jnp.float32) + folded[f"t{i}"]
        h = jnp.maximum(z, 0.0).astype(jnp.bfloat16)
    logits = jnp.dot(h, folded["w4"], preferred_element_type=jnp.float32) + folded["b4"]
    p = jax.nn.softmax(logits, axis=1).astype(jnp.bfloat16)
    return p[:, :folded["num_classes"]]


def mlp_reference_f32(x_nchw, raw, eps=1e-5):
    """Pure-f32 reference of the original module semantics (eval mode)."""
    h = x_nchw.reshape(x_nchw.shape[0], -1).astype(jnp.float32)
    for i in (1, 2, 3):
        h = h @ raw[f"w{i}"] + raw[f"b{i}"]
        s = raw[f"gamma{i}"] / jnp.sqrt(raw[f"var{i}"] + eps)
        h = (h - raw[f"mean{i}"]) * s + raw[f"beta{i}"]
        h = jnp.maximum(h, 0.0)
    logits = h @ raw["w4"] + raw["b4"]
    return jax.nn.softmax(logits, axis=1)


# --------------------------------------------------------------------------
if __name__ == "__main__":
    # Small shapes consistent with the module: CIFAR-like NCHW input,
    # flattened size = 3*16*16 = 768, hidden [256, 128, 64], 10 classes.
    B, C, H, W = 8, 3, 16, 16
    input_size = C * H * W
    hidden_sizes = [256, 128, 64]
    num_classes = 10

    key = jax.random.PRNGKey(0)
    k_x, k_p = jax.random.split(key)
    x = jax.random.normal(k_x, (B, C, H, W), dtype=jnp.float32)

    raw = make_params(k_p, input_size, hidden_sizes, num_classes)
    folded = fold_params(raw)

    out = mlp_forward(x, folded)
    out = jax.block_until_ready(out)
    assert out.shape == (B, num_classes)
    out_f32 = out.astype(jnp.float32)

    # 1) Tight check vs a reference with identical bf16/padded/folded numerics.
    ref_m = mlp_reference_matched(x, folded).astype(jnp.float32)
    assert jnp.allclose(out_f32, ref_m, atol=1e-2, rtol=1e-2), \
        "Pallas output mismatch vs numerics-matched reference"

    # 2) Loose check vs the exact f32 module semantics (bf16 rounding error).
    ref_f = mlp_reference_f32(x, raw)
    assert jnp.allclose(out_f32, ref_f, atol=5e-2, rtol=5e-2), \
        "Pallas output mismatch vs f32 semantic reference"

    # 3) Softmax rows sum to 1 (padded lanes contributed nothing; bf16 rounding).
    assert jnp.allclose(jnp.sum(out_f32, axis=1), 1.0, atol=2e-2)

    print("KERNEL_OK")
</pallas_src>

<mosaic_0001>
module attributes {stable_mosaic.version = 11 : i64} {
  func.func @mlp_kernel(%arg0: i32, %arg1: memref<16x768xf32, #tpu.memory_space<vmem>>, %arg2: memref<768x256xbf16, #tpu.memory_space<vmem>>, %arg3: memref<1x256xf32, #tpu.memory_space<vmem>>, %arg4: memref<256x128xbf16, #tpu.memory_space<vmem>>, %arg5: memref<1x128xf32, #tpu.memory_space<vmem>>, %arg6: memref<128x128xbf16, #tpu.memory_space<vmem>>, %arg7: memref<1x128xf32, #tpu.memory_space<vmem>>, %arg8: memref<128x128xbf16, #tpu.memory_space<vmem>>, %arg9: memref<1x128xf32, #tpu.memory_space<vmem>>, %arg10: memref<16x128xbf16, #tpu.memory_space<vmem>>) attributes {dimension_semantics = [#tpu.dimension_semantics<parallel>], iteration_bounds = array<i64: 1>, scalar_prefetch = 0 : i64, scratch_operands = 0 : i64, tpu.core_type = #tpu.core_type<tc>, window_params = [{transform_indices = @transform_0, window_bounds = array<i64: 16, 768>}, {pipeline_mode = #tpu.pipeline_mode<synchronous>, transform_indices = @transform_1, window_bounds = array<i64: 768, 256>}, {pipeline_mode = #tpu.pipeline_mode<synchronous>, transform_indices = @transform_2, window_bounds = array<i64: 1, 256>}, {pipeline_mode = #tpu.pipeline_mode<synchronous>, transform_indices = @transform_3, window_bounds = array<i64: 256, 128>}, {pipeline_mode = #tpu.pipeline_mode<synchronous>, transform_indices = @transform_4, window_bounds = array<i64: 1, 128>}, {pipeline_mode = #tpu.pipeline_mode<synchronous>, transform_indices = @transform_5, window_bounds = array<i64: 128, 128>}, {pipeline_mode = #tpu.pipeline_mode<synchronous>, transform_indices = @transform_6, window_bounds = array<i64: 1, 128>}, {pipeline_mode = #tpu.pipeline_mode<synchronous>, transform_indices = @transform_7, window_bounds = array<i64: 128, 128>}, {pipeline_mode = #tpu.pipeline_mode<synchronous>, transform_indices = @transform_8, window_bounds = array<i64: 1, 128>}, {transform_indices = @transform_9, window_bounds = array<i64: 16, 128>}]} {
    %c0 = arith.constant 0 : index
    %c0_0 = arith.constant 0 : index
    %0 = vector.load %arg1[%c0, %c0_0] : memref<16x768xf32, #tpu.memory_space<vmem>>, vector<16x768xf32>
    %1 = arith.truncf %0 : vector<16x768xf32> to vector<16x768xbf16>
    %c0_1 = arith.constant 0 : index
    %c0_2 = arith.constant 0 : index
    %2 = vector.load %arg2[%c0_1, %c0_2] : memref<768x256xbf16, #tpu.memory_space<vmem>>, vector<768x256xbf16>
    %cst = arith.constant dense<0.000000e+00> : vector<16x256xf32>
    %3 = tpu.matmul %1, %2, %cst {dimension_numbers = #tpu.dot_dimension_numbers<[1], [0], [0], [1], [0, 0, 1, 1], [], []>} : vector<16x768xbf16>, vector<768x256xbf16>, vector<16x256xf32> -> vector<16x256xf32>
    %c0_3 = arith.constant 0 : index
    %c0_4 = arith.constant 0 : index
    %4 = vector.load %arg3[%c0_3, %c0_4] : memref<1x256xf32, #tpu.memory_space<vmem>>, vector<1x256xf32>
    %5 = vector.broadcast %4 : vector<1x256xf32> to vector<16x256xf32>
    %6 = arith.addf %3, %5 : vector<16x256xf32>
    %cst_5 = arith.constant 0.000000e+00 : f32
    %7 = vector.broadcast %cst_5 : f32 to vector<16x256xf32>
    %8 = arith.maximumf %6, %7 : vector<16x256xf32>
    %9 = arith.truncf %8 : vector<16x256xf32> to vector<16x256xbf16>
    %c0_6 = arith.constant 0 : index
    %c0_7 = arith.constant 0 : index
    %10 = vector.load %arg4[%c0_6, %c0_7] : memref<256x128xbf16, #tpu.memory_space<vmem>>, vector<256x128xbf16>
    %cst_8 = arith.constant dense<0.000000e+00> : vector<16x128xf32>
    %11 = tpu.matmul %9, %10, %cst_8 {dimension_numbers = #tpu.dot_dimension_numbers<[1], [0], [0], [1], [0, 0, 1, 1], [], []>} : vector<16x256xbf16>, vector<256x128xbf16>, vector<16x128xf32> -> vector<16x128xf32>
    %c0_9 = arith.constant 0 : index
    %c0_10 = arith.constant 0 : index
    %12 = vector.load %arg5[%c0_9, %c0_10] : memref<1x128xf32, #tpu.memory_space<vmem>>, vector<1x128xf32>
    %13 = vector.broadcast %12 : vector<1x128xf32> to vector<16x128xf32>
    %14 = arith.addf %11, %13 : vector<16x128xf32>
    %cst_11 = arith.constant 0.000000e+00 : f32
    %15 = vector.broadcast %cst_11 : f32 to vector<16x128xf32>
    %16 = arith.maximumf %14, %15 : vector<16x128xf32>
    %17 = arith.truncf %16 : vector<16x128xf32> to vector<16x128xbf16>
    %c0_12 = arith.constant 0 : index
    %c0_13 = arith.constant 0 : index
    %18 = vector.load %arg6[%c0_12, %c0_13] : memref<128x128xbf16, #tpu.memory_space<vmem>>, vector<128x128xbf16>
    %cst_14 = arith.constant dense<0.000000e+00> : vector<16x128xf32>
    %19 = tpu.matmul %17, %18, %cst_14 {dimension_numbers = #tpu.dot_dimension_numbers<[1], [0], [0], [1], [0, 0, 1, 1], [], []>} : vector<16x128xbf16>, vector<128x128xbf16>, vector<16x128xf32> -> vector<16x128xf32>
    %c0_15 = arith.constant 0 : index
    %c0_16 = arith.constant 0 : index
    %20 = vector.load %arg7[%c0_15, %c0_16] : memref<1x128xf32, #tpu.memory_space<vmem>>, vector<1x128xf32>
    %21 = vector.broadcast %20 : vector<1x128xf32> to vector<16x128xf32>
    %22 = arith.addf %19, %21 : vector<16x128xf32>
    %cst_17 = arith.constant 0.000000e+00 : f32
    %23 = vector.broadcast %cst_17 : f32 to vector<16x128xf32>
    %24 = arith.maximumf %22, %23 : vector<16x128xf32>
    %25 = arith.truncf %24 : vector<16x128xf32> to vector<16x128xbf16>
    %c0_18 = arith.constant 0 : index
    %c0_19 = arith.constant 0 : index
    %26 = vector.load %arg8[%c0_18, %c0_19] : memref<128x128xbf16, #tpu.memory_space<vmem>>, vector<128x128xbf16>
    %cst_20 = arith.constant dense<0.000000e+00> : vector<16x128xf32>
    %27 = tpu.matmul %25, %26, %cst_20 {dimension_numbers = #tpu.dot_dimension_numbers<[1], [0], [0], [1], [0, 0, 1, 1], [], []>} : vector<16x128xbf16>, vector<128x128xbf16>, vector<16x128xf32> -> vector<16x128xf32>
    %c0_21 = arith.constant 0 : index
    %c0_22 = arith.constant 0 : index
    %28 = vector.load %arg9[%c0_21, %c0_22] : memref<1x128xf32, #tpu.memory_space<vmem>>, vector<1x128xf32>
    %29 = vector.broadcast %28 : vector<1x128xf32> to vector<16x128xf32>
    %30 = arith.addf %27, %29 : vector<16x128xf32>
    %cst_23 = arith.constant dense<0xFF800000> : vector<16xf32>
    %31 = vector.multi_reduction <maximumf>, %30, %cst_23 [1] : vector<16x128xf32> to vector<16xf32>
    %32 = vector.shape_cast %31 : vector<16xf32> to vector<16x1xf32>
    %33 = vector.broadcast %32 : vector<16x1xf32> to vector<16x128xf32>
    %34 = arith.subf %30, %33 : vector<16x128xf32>
    %35 = math.exp %34 : vector<16x128xf32>
    %cst_24 = arith.constant dense<0.000000e+00> : vector<16xf32>
    %36 = vector.multi_reduction <add>, %35, %cst_24 [1] : vector<16x128xf32> to vector<16xf32>
    %37 = vector.shape_cast %36 : vector<16xf32> to vector<16x1xf32>
    %38 = tpu.reciprocal %37 {approx = true} : vector<16x1xf32> -> vector<16x1xf32>
    %39 = vector.broadcast %38 : vector<16x1xf32> to vector<16x128xf32>
    %40 = arith.mulf %35, %39 : vector<16x128xf32>
    %41 = arith.truncf %40 : vector<16x128xf32> to vector<16x128xbf16>
    %c0_25 = arith.constant 0 : index
    %c0_26 = arith.constant 0 : index
    %42 = vector.load %arg10[%c0_25, %c0_26] : memref<16x128xbf16, #tpu.memory_space<vmem>>, vector<16x128xbf16>
    tpu.vector_store %arg10[%c0_25, %c0_26], %41 {strides = array<i32>} : memref<16x128xbf16, #tpu.memory_space<vmem>>, vector<16x128xbf16>,
    return
  }
  func.func @transform_0(%arg0: i32) -> (i32, i32) {
    %c0_i32 = arith.constant 0 : i32
    %c0_i32_0 = arith.constant 0 : i32
    return %arg0, %c0_i32 : i32, i32
  }
  func.func @transform_1(%arg0: i32) -> (i32, i32) {
    %c0_i32 = arith.constant 0 : i32
    %c0_i32_0 = arith.constant 0 : i32
    %c0_i32_1 = arith.constant 0 : i32
    return %c0_i32, %c0_i32_0 : i32, i32
  }
  func.func @transform_2(%arg0: i32) -> (i32, i32) {
    %c0_i32 = arith.constant 0 : i32
    %c0_i32_0 = arith.constant 0 : i32
    %c0_i32_1 = arith.constant 0 : i32
    return %c0_i32, %c0_i32_0 : i32, i32
  }
  func.func @transform_3(%arg0: i32) -> (i32, i32) {
    %c0_i32 = arith.constant 0 : i32
    %c0_i32_0 = arith.constant 0 : i32
    %c0_i32_1 = arith.constant 0 : i32
    return %c0_i32, %c0_i32_0 : i32, i32
  }
  func.func @transform_4(%arg0: i32) -> (i32, i32) {
    %c0_i32 = arith.constant 0 : i32
    %c0_i32_0 = arith.constant 0 : i32
    %c0_i32_1 = arith.constant 0 : i32
    return %c0_i32, %c0_i32_0 : i32, i32
  }
  func.func @transform_5(%arg0: i32) -> (i32, i32) {
    %c0_i32 = arith.constant 0 : i32
    %c0_i32_0 = arith.constant 0 : i32
    %c0_i32_1 = arith.constant 0 : i32
    return %c0_i32, %c0_i32_0 : i32, i32
  }
  func.func @transform_6(%arg0: i32) -> (i32, i32) {
    %c0_i32 = arith.constant 0 : i32
    %c0_i32_0 = arith.constant 0 : i32
    %c0_i32_1 = arith.constant 0 : i32
    return %c0_i32, %c0_i32_0 : i32, i32
  }
  func.func @transform_7(%arg0: i32) -> (i32, i32) {
    %c0_i32 = arith.constant 0 : i32
    %c0_i32_0 = arith.constant 0 : i32
    %c0_i32_1 = arith.constant 0 : i32
    return %c0_i32, %c0_i32_0 : i32, i32
  }
  func.func @transform_8(%arg0: i32) -> (i32, i32) {
    %c0_i32 = arith.constant 0 : i32
    %c0_i32_0 = arith.constant 0 : i32
    %c0_i32_1 = arith.constant 0 : i32
    return %c0_i32, %c0_i32_0 : i32, i32
  }
  func.func @transform_9(%arg0: i32) -> (i32, i32) {
    %c0_i32 = arith.constant 0 : i32
    %c0_i32_0 = arith.constant 0 : i32
    return %arg0, %c0_i32 : i32, i32
  }
}

</mosaic_0001>

<bundles_post_ra>
// kernel: tpu_custom_call.1
= control target key start
LH: loop header
LB: loop body
LE: loop exit
PB: predicated region body
PF: predicated region fallthrough
CT: control target
= control target key end

     0   :  { %14 = vsyncpa [#allocation3], 0  ;;  %s2046_s0 = inlined_call_operand.hbm [shape: f32[16,768], index: 0, kind: input, shape index: {}]   ;;  %s2047_s1 = inlined_call_operand.hbm [shape: bf16[768,256], index: 1, kind: input, shape index: {}]   ;;  %s2048_s2 = inlined_call_operand.vmem [shape: f32[1,256], index: 2, kind: input, shape index: {}]   ;;  %s2049_s3 = inlined_call_operand.hbm [shape: bf16[256,128], index: 3, kind: input, shape index: {}]   ;;  %s2050_s4 = inlined_call_operand.vmem [shape: f32[1,128], index: 4, kind: input, shape index: {}]   ;;  %s2051_s5 = inlined_call_operand.hbm [shape: bf16[128,128], index: 5, kind: input, shape index: {}]   ;;  %s2052_s6 = inlined_call_operand.vmem [shape: f32[1,128], index: 6, kind: input, shape index: {}]   ;;  %s2053_s7 = inlined_call_operand.hbm [shape: bf16[128,128], index: 7, kind: input, shape index: {}]   ;;  %s2054_s8 = inlined_call_operand.vmem [shape: f32[1,128], index: 8, kind: input, shape index: {}]   ;;  %s2055_s9 = inlined_call_operand.hbm [shape: bf16[16,128], index: 9, kind: output, shape index: {}]  }
   0x1   :  { %15 = vsyncpa [#allocation6], 0 }
   0x2   :  { %16 = vsyncpa [#allocation9], 0 }
   0x3   :  { %17 = vsyncpa [#allocation4], 0  ;;  %s1866_s30 = smov [#allocation5]   ;;  %s1726_s13 = scalar_lea.hbm %s2047_s1, 12288 }
   0x4   :  { %s35_s10 = sshll.u32 %s1866_s30, 4  ;;  %p1727_p0 = scmp.ne.s32.totalorder %s2047_s1, %s1726_s13  ;;  %s36_s10 = int_to_ptr.vmem [resolvable:$true] %s35_s10 }
   0x5   :  { %p1730_p1 = scmp.lt.u32.totalorder %s1726_s13, %s2047_s1 }
   0x7   :  { %p1732_p2 = pnand %p1730_p1, %p1727_p0 }
   0x9   :  { %1735 = shalt.err (!%p1732_p2)
}
   0xa   :  { %s1736_s18 = scalar_lea.vmem %s36_s10, 12288  ;;  %p1741_p4 = scmp.lt.s32.totalorder %s36_s10, %s36_s10 }
   0xb   :  { %p1737_p3 = scmp.ne.s32.totalorder %s36_s10, %s1736_s18  ;;  %p1742_p5 = scmp.lt.s32.totalorder %s1736_s18, %s1736_s18 }
   0xd   :  { %p1743_p6 = por %p1742_p5, %p1741_p4 }
   0xf   :  { %p1744_p7 = pnand %p1743_p6, %p1737_p3 }
  0x11   :  { %1747 = shalt.err (!%p1744_p7)
}
  0x12   :  { %s1867_s19 = smov 128   ;;  %s1868_s20 = smov 8  }
  0x13   :  { %41 = dma.hbm_to_vmem [thread:$0]  %s2047_s1, 12288, %s36_s10, [#allocation6], %s1867_s19, %s1867_s19, %s1868_s20  }
  0x14   :  { %s1869_s23 = smov [#allocation8]   ;;  %s1870_s25 = smov [#allocation2]  }
  0x15   :  { %s63_s24 = sshll.u32 %s1869_s23, 4  ;;  %s23_s26 = sshll.u32 %s1870_s25, 4  ;;  %s64_s24 = int_to_ptr.vmem [resolvable:$true] %s63_s24  ;;  %s24_s26 = int_to_ptr.vmem [resolvable:$true] %s23_s26 }
  0x16   :  { %s1748_s29 = scalar_lea.hbm %s2051_s5, 1024 }
  0x17   :  { %p1749_p8 = scmp.ne.s32.totalorder %s2051_s5, %s1748_s29  ;;  %p1752_p9 = scmp.lt.u32.totalorder %s1748_s29, %s2051_s5 }
  0x19   :  { %p1754_p10 = pnand %p1752_p9, %p1749_p8 }
  0x1b   :  { %1757 = shalt.err (!%p1754_p10)
}
  0x1c   :  { %s1758_s1 = scalar_lea.vmem %s64_s24, 1024  ;;  %p1763_p12 = scmp.lt.s32.totalorder %s64_s24, %s64_s24 }
  0x1d   :  { %p1759_p11 = scmp.ne.s32.totalorder %s64_s24, %s1758_s1  ;;  %p1764_p13 = scmp.lt.s32.totalorder %s1758_s1, %s1758_s1 }
  0x1f   :  { %p1765_p0 = por %p1764_p13, %p1763_p12 }
  0x21   :  { %p1766_p1 = pnand %p1765_p0, %p1759_p11 }
  0x23   :  { %1769 = shalt.err (!%p1766_p1)
}
  0x24   :  { %s1871_s10 = smov 64   ;;  %s1872_s14 = smov 4  }
  0x25   :  { %69 = dma.hbm_to_vmem [thread:$0]  %s2051_s5, 1024, %s64_s24, [#allocation9], %s1871_s10, %s1871_s10, %s1872_s14  }
  0x26   :  { %s1770_s19 = scalar_lea.hbm %s2046_s0, 1536 }
  0x27   :  { %p1771_p2 = scmp.ne.s32.totalorder %s2046_s0, %s1770_s19  ;;  %p1774_p3 = scmp.lt.u32.totalorder %s1770_s19, %s2046_s0 }
  0x29   :  { %p1776_p4 = pnand %p1774_p3, %p1771_p2 }
  0x2b   :  { %1779 = shalt.err (!%p1776_p4)
}
  0x2c   :  { %s1780_s25 = scalar_lea.vmem %s24_s26, 1536  ;;  %p1785_p6 = scmp.lt.s32.totalorder %s24_s26, %s24_s26 }
  0x2d   :  { %p1781_p5 = scmp.ne.s32.totalorder %s24_s26, %s1780_s25  ;;  %p1786_p7 = scmp.lt.s32.totalorder %s1780_s25, %s1780_s25 }
  0x2f   :  { %p1787_p8 = por %p1786_p7, %p1785_p6 }
  0x31   :  { %p1788_p9 = pnand %p1787_p8, %p1781_p5 }
  0x33   :  { %1791 = shalt.err (!%p1788_p9)
}
  0x34   :  { %s1873_s5 = smov 768   ;;  %s1874_s24 = smov 48  }
  0x35   :  { %29 = dma.hbm_to_vmem [thread:$0]  %s2046_s0, 1536, %s24_s26, [#allocation3], %s1873_s5, %s1873_s5, %s1874_s24  }
  0x36   :  { %s1875_s29 = smov [#allocation7]   ;;  %s1876_s11 = smov [#allocation10]  }
  0x37   :  { %s49_s30 = sshll.u32 %s1875_s29, 4  ;;  %s77_s12 = sshll.u32 %s1876_s11, 4  ;;  %s50_s30 = int_to_ptr.vmem [resolvable:$true] %s49_s30  ;;  %s78_s12 = int_to_ptr.vmem [resolvable:$true] %s77_s12 }
  0x38   :  { %s1792_s15 = scalar_lea.hbm %s2049_s3, 2048 }
  0x39   :  { %p1793_p10 = scmp.ne.s32.totalorder %s2049_s3, %s1792_s15  ;;  %p1796_p11 = scmp.lt.u32.totalorder %s1792_s15, %s2049_s3 }
  0x3b   :  { %p1798_p12 = pnand %p1796_p11, %p1793_p10 }
  0x3d   :  { %1801 = shalt.err (!%p1798_p12)
}
  0x3e   :  { %s1802_s0 = scalar_lea.vmem %s50_s30, 2048  ;;  %p1807_p0 = scmp.lt.s32.totalorder %s50_s30, %s50_s30 }
  0x3f   :  { %p1803_p13 = scmp.ne.s32.totalorder %s50_s30, %s1802_s0  ;;  %p1808_p1 = scmp.lt.s32.totalorder %s1802_s0, %s1802_s0 }
  0x41   :  { %p1809_p2 = por %p1808_p1, %p1807_p0 }
  0x43   :  { %p1810_p3 = pnand %p1809_p2, %p1803_p13 }
  0x45   :  { %1813 = shalt.err (!%p1810_p3)
}
  0x46   :  { %55 = dma.hbm_to_vmem [thread:$0]  %s2049_s3, 2048, %s50_s30, [#allocation6], %s1871_s10, %s1871_s10, %s1872_s14  }
  0x47   :  { %s1814_s23 = scalar_lea.hbm %s2053_s7, 1024 }
  0x48   :  { %p1815_p4 = scmp.ne.s32.totalorder %s2053_s7, %s1814_s23  ;;  %p1818_p5 = scmp.lt.u32.totalorder %s1814_s23, %s2053_s7 }
  0x4a   :  { %p1820_p6 = pnand %p1818_p5, %p1815_p4 }
  0x4c   :  { %1823 = shalt.err (!%p1820_p6)
}
  0x4d   :  { %s1824_s28 = scalar_lea.vmem %s78_s12, 1024  ;;  %p1829_p8 = scmp.lt.s32.totalorder %s78_s12, %s78_s12 }
  0x4e   :  { %p1825_p7 = scmp.ne.s32.totalorder %s78_s12, %s1824_s28  ;;  %p1830_p9 = scmp.lt.s32.totalorder %s1824_s28, %s1824_s28 }
  0x50   :  { %p1831_p10 = por %p1830_p9, %p1829_p8 }
  0x52   :  { %p1832_p11 = pnand %p1831_p10, %p1825_p7 }
  0x54   :  { %1835 = shalt.err (!%p1832_p11)
}
  0x55   :  { %83 = dma.hbm_to_vmem [thread:$0]  %s2053_s7, 1024, %s78_s12, [#allocation9], %s1871_s10, %s1871_s10, %s1872_s14  }
  0x56   :  { %1858 = dma.done.wait [#allocation3], 1536  }
  0x57   :  { %1859 = vsyncadd [#allocation3], 4294965760 }
  0x58   :  { %1860 = dma.done.wait [#allocation6], 14336  }
  0x59   :  { %1861 = vsyncadd [#allocation6], 4294952960 }
  0x5a   :  { %1862 = dma.done.wait [#allocation9], 2048  }
  0x5b   :  { %1863 = vsyncadd [#allocation9], 4294965248  ;;  %v1542_v0 = vld [vmem:[#allocation5 + $0x104] ss:$8 sps:$4 sm:$0xff]   ;;  %v1544_v1 = vld [vmem:[#allocation5 + $0x100] ss:$8 sps:$4 sm:$0xff]  }
  0x5c   :  { %751 = vmatprep.subr.bf16.mxu0 %v1542_v0  ;;  %v1545_v2 = vld [vmem:[#allocation5 + $0x114] ss:$8 sps:$4 sm:$0xff]   ;;  %v1547_v3 = vld [vmem:[#allocation5 + $0x110] ss:$8 sps:$4 sm:$0xff]   ;;  %v1548_v4 = vld [vmem:[#allocation5 + $0x124] ss:$8 sps:$4 sm:$0xff]  }
  0x5d   :  { %752 = vmatpush1.bf16.msra.mxu0 %v1544_v1  ;;  %v1550_v5 = vld [vmem:[#allocation5 + $0x120] ss:$8 sps:$4 sm:$0xff]   ;;  %v1551_v6 = vld [vmem:[#allocation5 + $0x134] ss:$8 sps:$4 sm:$0xff]   ;;  %v1553_v7 = vld [vmem:[#allocation5 + $0x130] ss:$8 sps:$4 sm:$0xff]  }
  0x5e   :  { %753 = vmatprep.subr.bf16.mxu0 %v1545_v2  ;;  %v1554_v8 = vld [vmem:[#allocation5 + $0x144] ss:$8 sps:$4 sm:$0xff]   ;;  %v1556_v9 = vld [vmem:[#allocation5 + $0x140] ss:$8 sps:$4 sm:$0xff]   ;;  %v1557_v10 = vld [vmem:[#allocation5 + $0x154] ss:$8 sps:$4 sm:$0xff]  }
  0x5f   :  { %v1559_v11 = vld [vmem:[#allocation5 + $0x150] ss:$8 sps:$4 sm:$0xff]   ;;  %v1560_v12 = vld [vmem:[#allocation5 + $0x164] ss:$8 sps:$4 sm:$0xff]   ;;  %v1589_v14 = vld [vmem:[#allocation5] ss:$8 sps:$4 sm:$0xff]  }
  0x60   :  { %v1587_v13 = vld [vmem:[#allocation5 + $0x4] ss:$8 sps:$4 sm:$0xff]   ;;  %v1562_v15 = vld [vmem:[#allocation5 + $0x160] ss:$8 sps:$4 sm:$0xff]   ;;  %v1563_v16 = vld [vmem:[#allocation5 + $0x174] ss:$8 sps:$4 sm:$0xff]  }
  0x61   :  { %754 = vmatpush1.bf16.msra.mxu0 %v1547_v3  ;;  %708 = vmatprep.subr.bf16.mxu1 %v1587_v13  ;;  %v1593_v17 = vld [vmem:[#allocation5 + $0x14] ss:$8 sps:$4 sm:$0xff]   ;;  %v1595_v18 = vld [vmem:[#allocation5 + $0x10] ss:$8 sps:$4 sm:$0xff]   ;;  %v111_v20 = vld [vmem:[#allocation2 + $0x48] sm:$0xff]  ;;  %vm1878_vm0 = vmmov 0  }
  0x62   :  { %755 = vmatprep.subr.bf16.mxu0 %v1548_v4  ;;  %709 = vmatpush1.bf16.msra.mxu1 %v1589_v14  ;;  %v105_v19 = vld [vmem:[#allocation2 + $0x18] sm:$0xff]  ;;  %v1599_v23 = vld [vmem:[#allocation5 + $0x24] ss:$8 sps:$4 sm:$0xff]   ;;  %v1601_v24 = vld [vmem:[#allocation5 + $0x20] ss:$8 sps:$4 sm:$0xff]  }
  0x63   :  { %710 = vmatprep.subr.bf16.mxu1 %v1593_v17  ;;  %v117_v21 = vpack.c.bf16 %v111_v20, %v105_v19  ;;  %v1565_v22 = vld [vmem:[#allocation5 + $0x170] ss:$8 sps:$4 sm:$0xff]   ;;  %v1566_v25 = vld [vmem:[#allocation5 + $0x184] ss:$8 sps:$4 sm:$0xff]   ;;  %v1568_v26 = vld [vmem:[#allocation5 + $0x180] ss:$8 sps:$4 sm:$0xff]  }
  0x64   :  { %v1605_v27 = vld [vmem:[#allocation5 + $0x34] ss:$8 sps:$4 sm:$0xff]   ;;  %v1607_v29 = vld [vmem:[#allocation5 + $0x30] ss:$8 sps:$4 sm:$0xff]   ;;  %v1611_v30 = vld [vmem:[#allocation5 + $0x44] ss:$8 sps:$4 sm:$0xff]  }
  0x65   :  { %756 = vmatpush1.bf16.msra.mxu0 %v1550_v5  ;;  %783 = vmatprep.mubr.bf16.mxu0 %v117_v21  ;;  %v1569_v28 = vld [vmem:[#allocation5 + $0x194] ss:$8 sps:$4 sm:$0xff]   ;;  %v1571_v31 = vld [vmem:[#allocation5 + $0x190] ss:$8 sps:$4 sm:$0xff]   ;;  %v1572_v32 = vld [vmem:[#allocation5 + $0x1a4] ss:$8 sps:$4 sm:$0xff]  }
  0x66   :  { %757 = vmatprep.subr.bf16.mxu0 %v1551_v6  ;;  %711 = vmatpush1.bf16.msra.mxu1 %v1595_v18  ;;  %v1613_v33 = vld [vmem:[#allocation5 + $0x40] ss:$8 sps:$4 sm:$0xff]   ;;  %v1617_v34 = vld [vmem:[#allocation5 + $0x54] ss:$8 sps:$4 sm:$0xff]   ;;  %v1619_v37 = vld [vmem:[#allocation5 + $0x50] ss:$8 sps:$4 sm:$0xff]  }
  0x67   :  { %712 = vmatprep.subr.bf16.mxu1 %v1599_v23  ;;  %v1574_v35 = vld [vmem:[#allocation5 + $0x1a0] ss:$8 sps:$4 sm:$0xff]   ;;  %v1575_v36 = vld [vmem:[#allocation5 + $0x1b4] ss:$8 sps:$4 sm:$0xff]   ;;  %v1623_v38 = vld [vmem:[#allocation5 + $0x64] ss:$8 sps:$4 sm:$0xff]  }
  0x68   :  { %v1577_v39 = vld [vmem:[#allocation5 + $0x1b0] ss:$8 sps:$4 sm:$0xff]   ;;  %v1578_v40 = vld [vmem:[#allocation5 + $0x1c4] ss:$8 sps:$4 sm:$0xff]   ;;  %v1625_v41 = vld [vmem:[#allocation5 + $0x60] ss:$8 sps:$4 sm:$0xff]  }
  0x69   :  { %758 = vmatpush1.bf16.msra.mxu0 %v1553_v7  ;;  %v1629_v42 = vld [vmem:[#allocation5 + $0x74] ss:$8 sps:$4 sm:$0xff]   ;;  %v1580_v43 = vld [vmem:[#allocation5 + $0x1c0] ss:$8 sps:$4 sm:$0xff]   ;;  %v1631_v45 = vld [vmem:[#allocation5 + $0x70] ss:$8 sps:$4 sm:$0xff]  }
  0x6a   :  { %759 = vmatprep.subr.bf16.mxu0 %v1554_v8  ;;  %713 = vmatpush1.bf16.msra.mxu1 %v1601_v24  ;;  %v1581_v44 = vld [vmem:[#allocation5 + $0x1d4] ss:$8 sps:$4 sm:$0xff]   ;;  %v1635_v46 = vld [vmem:[#allocation5 + $0x84] ss:$8 sps:$4 sm:$0xff]   ;;  %v1583_v47 = vld [vmem:[#allocation5 + $0x1d0] ss:$8 sps:$4 sm:$0xff]  }
  0x6b   :  { %714 = vmatprep.subr.bf16.mxu1 %v1605_v27  ;;  %v1584_v48 = vld [vmem:[#allocation5 + $0x1e4] ss:$8 sps:$4 sm:$0xff]   ;;  %v1637_v49 = vld [vmem:[#allocation5 + $0x80] ss:$8 sps:$4 sm:$0xff]   ;;  %v1641_v50 = vld [vmem:[#allocation5 + $0x94] ss:$8 sps:$4 sm:$0xff]  }
  0x6c   :  { %v1586_v51 = vld [vmem:[#allocation5 + $0x1e0] ss:$8 sps:$4 sm:$0xff]   ;;  %v1590_v52 = vld [vmem:[#allocation5 + $0x1f4] ss:$8 sps:$4 sm:$0xff]   ;;  %v1643_v53 = vld [vmem:[#allocation5 + $0x90] ss:$8 sps:$4 sm:$0xff]  }
  0x6d   :  { %760 = vmatpush1.bf16.msra.mxu0 %v1556_v9  ;;  %v1647_v54 = vld [vmem:[#allocation5 + $0xa4] ss:$8 sps:$4 sm:$0xff]   ;;  %v1592_v55 = vld [vmem:[#allocation5 + $0x1f0] ss:$8 sps:$4 sm:$0xff]   ;;  %v1649_v59 = vld [vmem:[#allocation5 + $0xa0] ss:$8 sps:$4 sm:$0xff]  }
  0x6e   :  { %761 = vmatprep.subr.bf16.mxu0 %v1557_v10  ;;  %715 = vmatpush1.bf16.msra.mxu1 %v1607_v29  ;;  %v1598_v56 = vld [vmem:[#allocation5 + $0x204] ss:$8 sps:$4 sm:$0xff]   ;;  %v104_v57 = vld [vmem:[#allocation2 + $0x10] sm:$0xff]  ;;  %v1596_v61 = vld [vmem:[#allocation5 + $0x200] ss:$8 sps:$4 sm:$0xff]  }
  0x6f   :  { %716 = vmatprep.subr.bf16.mxu1 %v1611_v30  ;;  %v110_v58 = vld [vmem:[#allocation2 + $0x40] sm:$0xff]  ;;  %v1653_v60 = vld [vmem:[#allocation5 + $0xb4] ss:$8 sps:$4 sm:$0xff]   ;;  %v1655_v0 = vld [vmem:[#allocation5 + $0xb0] ss:$8 sps:$4 sm:$0xff]  }
  0x70   :  { %v116_v62 = vpack.c.bf16 %v110_v58, %v104_v57  ;;  %v1604_v63 = vld [vmem:[#allocation5 + $0x214] ss:$8 sps:$4 sm:$0xff]   ;;  %v1659_v1 = vld [vmem:[#allocation5 + $0xc4] ss:$8 sps:$4 sm:$0xff]   ;;  %v1602_v5 = vld [vmem:[#allocation5 + $0x210] ss:$8 sps:$4 sm:$0xff]  }
  0x71   :  { %762 = vmatpush1.bf16.msra.mxu0 %v1559_v11  ;;  %v103_v2 = vld [vmem:[#allocation2 + $0x8] sm:$0xff]  ;;  %v109_v3 = vld [vmem:[#allocation2 + $0x38] sm:$0xff]  ;;  %v108_v23 = vld [vmem:[#allocation2 + $0x30] sm:$0xff] }
  0x72   :  { %763 = vmatprep.subr.bf16.mxu0 %v1560_v12  ;;  %717 = vmatpush1.bf16.msra.mxu1 %v1613_v33  ;;  %v115_v4 = vpack.c.bf16 %v109_v3, %v103_v2  ;;  %v107_v6 = vld [vmem:[#allocation2 + $0x28] sm:$0xff]  ;;  %v113_v9 = vld [vmem:[#allocation2 + $0x58] sm:$0xff]  ;;  %v1687_v27 = vld [vmem:[#allocation7] sm:$0xff]   ;;  %v1877_v2 = vmov 0.0  }
  0x73   :  { %718 = vmatprep.subr.bf16.mxu1 %v1617_v34  ;;  %v1610_v7 = vld [vmem:[#allocation5 + $0x224] ss:$8 sps:$4 sm:$0xff]   ;;  %v1661_v8 = vld [vmem:[#allocation5 + $0xc0] ss:$8 sps:$4 sm:$0xff]   ;;  %v1665_v10 = vld [vmem:[#allocation5 + $0xd4] ss:$8 sps:$4 sm:$0xff]   ;;  %v119_v11 = vpack.c.bf16 %v113_v9, %v107_v6 }
  0x74   :  { %v1608_v12 = vld [vmem:[#allocation5 + $0x220] ss:$8 sps:$4 sm:$0xff]   ;;  %740 = vmatprep.mubr.bf16.mxu1 %v115_v4  ;;  %v1616_v13 = vld [vmem:[#allocation5 + $0x234] ss:$8 sps:$4 sm:$0xff]   ;;  %v1667_v14 = vld [vmem:[#allocation5 + $0xd0] ss:$8 sps:$4 sm:$0xff]  }
  0x75   :  { %764 = vmatpush1.bf16.msra.mxu0 %v1562_v15  ;;  %v1671_v15 = vld [vmem:[#allocation5 + $0xe4] ss:$8 sps:$4 sm:$0xff]   ;;  %v1673_v18 = vld [vmem:[#allocation5 + $0xe0] ss:$8 sps:$4 sm:$0xff]   ;;  %v1677_v19 = vld [vmem:[#allocation5 + $0xf4] ss:$8 sps:$4 sm:$0xff]  }
  0x76   :  { %765 = vmatprep.subr.bf16.mxu0 %v1563_v16  ;;  %719 = vmatpush1.bf16.msra.mxu1 %v1619_v37  ;;  %v1614_v16 = vld [vmem:[#allocation5 + $0x230] ss:$8 sps:$4 sm:$0xff]   ;;  %v1622_v17 = vld [vmem:[#allocation5 + $0x244] ss:$8 sps:$4 sm:$0xff]   ;;  %v1620_v20 = vld [vmem:[#allocation5 + $0x240] ss:$8 sps:$4 sm:$0xff]  }
  0x77   :  { %720 = vmatprep.subr.bf16.mxu1 %v1623_v38  ;;  %v1679_v21 = vld [vmem:[#allocation5 + $0xf0] ss:$8 sps:$4 sm:$0xff]   ;;  %v1628_v24 = vld [vmem:[#allocation5 + $0x254] ss:$8 sps:$4 sm:$0xff]   ;;  %v1688_v30 = vld [vmem:[#allocation7 + $0x48] sm:$0xff]  }
  0x78   :  { %v1640_v33 = vld [vmem:[#allocation5 + $0x274] ss:$8 sps:$4 sm:$0xff]   ;;  %v1646_v37 = vld [vmem:[#allocation5 + $0x284] ss:$8 sps:$4 sm:$0xff]  }
  0x79   :  { %766 = vmatpush1.bf16.msra.mxu0 %v1565_v22  ;;  %v102_v22 = vld [vmem:[#allocation2] sm:$0xff]  ;;  %v1690_v34 = vld [vmem:[#allocation7 + $0x50] sm:$0xff]   ;;  %v1692_v38 = vld [vmem:[#allocation7 + $0x58] sm:$0xff]  }
  0x7a   :  { %767 = vmatprep.subr.bf16.mxu0 %v1566_v25  ;;  %721 = vmatpush1.bf16.msra.mxu1 %v1625_v41  ;;  %v1686_v25 = vld [vmem:[#allocation7 + $0x40] sm:$0xff]   ;;  %v114_v29 = vpack.c.bf16 %v108_v23, %v102_v22  ;;  %v1652_v41 = vld [vmem:[#allocation5 + $0x294] ss:$8 sps:$4 sm:$0xff]  }
  0x7b   :  { %722 = vmatprep.subr.bf16.mxu1 %v1629_v42  ;;  %v1650_v42 = vld [vmem:[#allocation5 + $0x290] ss:$8 sps:$4 sm:$0xff]   ;;  %v1694_v58 = vld [vmem:[#allocation7 + $0x60] sm:$0xff]  }
  0x7d   :  { %768 = vmatpush1.bf16.msra.mxu0 %v1568_v26  ;;  %v1626_v26 = vld [vmem:[#allocation5 + $0x250] ss:$8 sps:$4 sm:$0xff]  }
  0x7e   :  { %769 = vmatprep.subr.bf16.mxu0 %v1569_v28  ;;  %723 = vmatpush1.bf16.msra.mxu1 %v1631_v45  ;;  %v1634_v28 = vld [vmem:[#allocation5 + $0x264] ss:$8 sps:$4 sm:$0xff]   ;;  %v1664_v45 = vld [vmem:[#allocation5 + $0x2b4] ss:$8 sps:$4 sm:$0xff]  }
  0x7f   :  { %724 = vmatprep.subr.bf16.mxu1 %v1635_v46  ;;  %v1662_v46 = vld [vmem:[#allocation5 + $0x2b0] ss:$8 sps:$4 sm:$0xff]  }
  0x81   :  { %770 = vmatpush1.bf16.msra.mxu0 %v1571_v31  ;;  %v1632_v31 = vld [vmem:[#allocation5 + $0x260] ss:$8 sps:$4 sm:$0xff]  }
  0x82   :  { %771 = vmatprep.subr.bf16.mxu0 %v1572_v32  ;;  %725 = vmatpush1.bf16.msra.mxu1 %v1637_v49  ;;  %v1689_v32 = vld [vmem:[#allocation7 + $0x8] sm:$0xff]   ;;  %v1676_v49 = vld [vmem:[#allocation5 + $0x2d4] ss:$8 sps:$4 sm:$0xff]  }
  0x83   :  { %726 = vmatprep.subr.bf16.mxu1 %v1641_v50  ;;  %v1674_v50 = vld [vmem:[#allocation5 + $0x2d0] ss:$8 sps:$4 sm:$0xff]  }
  0x85   :  { %772 = vmatpush1.bf16.msra.mxu0 %v1574_v35  ;;  %v1638_v35 = vld [vmem:[#allocation5 + $0x270] ss:$8 sps:$4 sm:$0xff]  }
  0x86   :  { %773 = vmatprep.subr.bf16.mxu0 %v1575_v36  ;;  %727 = vmatpush1.bf16.msra.mxu1 %v1643_v53  ;;  %v1691_v36 = vld [vmem:[#allocation7 + $0x10] sm:$0xff]  }
  0x87   :  { %728 = vmatprep.subr.bf16.mxu1 %v1647_v54  ;;  %v1685_v53 = vld [vmem:[#allocation5 + $0x2f4] ss:$8 sps:$4 sm:$0xff]   ;;  %v1683_v54 = vld [vmem:[#allocation5 + $0x2f0] ss:$8 sps:$4 sm:$0xff]  }
  0x89   :  { %774 = vmatpush1.bf16.msra.mxu0 %v1577_v39  ;;  %v1644_v39 = vld [vmem:[#allocation5 + $0x280] ss:$8 sps:$4 sm:$0xff]  }
  0x8a   :  { %775 = vmatprep.subr.bf16.mxu0 %v1578_v40  ;;  %729 = vmatpush1.bf16.msra.mxu1 %v1649_v59  ;;  %v1693_v40 = vld [vmem:[#allocation7 + $0x18] sm:$0xff]   ;;  %v1695_v59 = vld [vmem:[#allocation7 + $0x20] sm:$0xff]  }
  0x8b   :  { %730 = vmatprep.subr.bf16.mxu1 %v1653_v60  ;;  %v1696_v60 = vld [vmem:[#allocation7 + $0x68] sm:$0xff]  }
  0x8d   :  { %776 = vmatpush1.bf16.msra.mxu0 %v1580_v43  ;;  %v1658_v43 = vld [vmem:[#allocation5 + $0x2a4] ss:$8 sps:$4 sm:$0xff]  }
  0x8e   :  { %777 = vmatprep.subr.bf16.mxu0 %v1581_v44  ;;  %731 = vmatpush1.bf16.msra.mxu1 %v1655_v0  ;;  %v1656_v44 = vld [vmem:[#allocation5 + $0x2a0] ss:$8 sps:$4 sm:$0xff]   ;;  %v1700_v0 = vld [vmem:[#allocation7 + $0x78] sm:$0xff]  }
  0x8f   :  { %732 = vmatprep.subr.bf16.mxu1 %v1659_v1  ;;  %v1701_v1 = vld [vmem:[#allocation7 + $0x38] sm:$0xff]  }
  0x91   :  { %778 = vmatpush1.bf16.msra.mxu0 %v1583_v47  ;;  %v1670_v47 = vld [vmem:[#allocation5 + $0x2c4] ss:$8 sps:$4 sm:$0xff]  }
  0x92   :  { %779 = vmatprep.subr.bf16.mxu0 %v1584_v48  ;;  %733 = vmatpush1.bf16.msra.mxu1 %v1661_v8  ;;  %v1668_v48 = vld [vmem:[#allocation5 + $0x2c0] ss:$8 sps:$4 sm:$0xff]  }
  0x93   :  { %734 = vmatprep.subr.bf16.mxu1 %v1665_v10  ;;  %v216_v10 = vld [vmem:[%s2048_s2] sm:$0x3] }
  0x95   :  { %780 = vmatpush1.bf16.msra.mxu0 %v1586_v51  ;;  %v1682_v51 = vld [vmem:[#allocation5 + $0x2e4] ss:$8 sps:$4 sm:$0xff]  }
  0x96   :  { %781 = vmatprep.subr.bf16.mxu0 %v1590_v52  ;;  %735 = vmatpush1.bf16.msra.mxu1 %v1667_v14  ;;  %v1680_v52 = vld [vmem:[#allocation5 + $0x2e0] ss:$8 sps:$4 sm:$0xff]  }
  0x97   :  { %736 = vmatprep.subr.bf16.mxu1 %v1671_v15 }
  0x99   :  { %782 = vmatpush1.bf16.msra.mxu0 %v1592_v55  ;;  %v106_v55 = vld [vmem:[#allocation2 + $0x20] sm:$0xff] }
  0x9a   :  { %794 = vmatprep.subr.bf16.mxu0 %v1598_v56  ;;  %737 = vmatpush1.bf16.msra.mxu1 %v1673_v18  ;;  %v112_v56 = vld [vmem:[#allocation2 + $0x50] sm:$0xff] }
  0x9b   :  { %738 = vmatprep.subr.bf16.mxu1 %v1677_v19  ;;  %v118_v57 = vpack.c.bf16 %v112_v56, %v106_v55  ;;  %v1713_v55 = vld [vmem:[#allocation10 + $0x18] sm:$0xff]   ;;  %v1714_v56 = vld [vmem:[#allocation10 + $0x20] sm:$0xff]  }
  0x9c   :  { %784 = vmatmul.mubr.bf16.vlgmr.msra.gmra.mrb[0].mxu0 %v116_v62  ;;  %v1698_v62 = vld [vmem:[#allocation7 + $0x70] sm:$0xff]  }
  0x9d   :  { %795 = vmatpush1.bf16.msra.mxu0 %v1596_v61  ;;  %826 = vmatprep.mubr.bf16.mxu0 %v119_v11  ;;  %v1697_v61 = vld [vmem:[#allocation7 + $0x28] sm:$0xff]  }
  0x9e   :  { %796 = vmatprep.subr.bf16.mxu0 %v1604_v63  ;;  %739 = vmatpush1.bf16.msra.mxu1 %v1679_v21  ;;  %v1699_v63 = vld [vmem:[#allocation7 + $0x30] sm:$0xff]  }
  0x9f   :  { %1436 = vmatprep.subr.bf16.mxu1 %v1686_v25 }
  0xa1   :  { %797 = vmatpush1.bf16.msra.mxu0 %v1602_v5  ;;  %741 = vmatmul.mubr.bf16.vlgmr.msra.gmra.mrb[0].mxu1 %v114_v29 }
  0xa2   :  { %798 = vmatprep.subr.bf16.mxu0 %v1610_v7  ;;  %1437 = vmatpush3.bf16.msra.mxu1 %v1687_v27  ;;  %v218_v7 = vlaneseq }
  0xa3   :  { %1438 = vmatprep.subr.bf16.mxu1 %v1688_v30 }
  0xa4   :  { %v219_v8 = vshrl.u32 %v218_v7, 7 }
  0xa5   :  { %799 = vmatpush1.bf16.msra.mxu0 %v1608_v12 }
  0xa6   :  { %800 = vmatprep.subr.bf16.mxu0 %v1616_v13  ;;  %1439 = vmatpush3.bf16.msra.mxu1 %v1689_v32  ;;  %v220_v9 = vsub.s32 0, %v219_v8  ;;  %v224_v11 = vsub.s32 1, %v219_v8  ;;  %v1702_v32 = vld [vmem:[#allocation8] sm:$0xff]  }
  0xa7   :  { %1440 = vmatprep.subr.bf16.mxu1 %v1690_v34  ;;  %v1704_v34 = vld [vmem:[#allocation8 + $0x10] sm:$0xff]  }
  0xa8   :  { %v221_v12 = vrot.slane %v216_v10, %v220_v9  ;;  %v225_v13 = vrot.slane %v216_v10, %v224_v11 }
  0xa9   :  { %801 = vmatpush1.bf16.msra.mxu0 %v1614_v16 }
  0xaa   :  { %802 = vmatprep.subr.bf16.mxu0 %v1622_v17  ;;  %1441 = vmatpush3.bf16.msra.mxu1 %v1691_v36  ;;  %v1706_v36 = vld [vmem:[#allocation8 + $0x20] sm:$0xff]  }
  0xab   :  { %1442 = vmatprep.subr.bf16.mxu1 %v1692_v38  ;;  %v1708_v38 = vld [vmem:[#allocation8 + $0x30] sm:$0xff]  }
  0xad   :  { %803 = vmatpush1.bf16.msra.mxu0 %v1620_v20 }
  0xae   :  { %804 = vmatprep.subr.bf16.mxu0 %v1628_v24  ;;  %1443 = vmatpush3.bf16.msra.mxu1 %v1693_v40 }
  0xaf   :  { %1444 = vmatprep.subr.bf16.mxu1 %v1694_v58  ;;  %v1716_v58 = vld [vmem:[#allocation10 + $0x30] sm:$0xff]  }
  0xb1   :  { %805 = vmatpush1.bf16.msra.mxu0 %v1626_v26 }
  0xb2   :  { %806 = vmatprep.subr.bf16.mxu0 %v1634_v28  ;;  %1445 = vmatpush3.bf16.msra.mxu1 %v1695_v59  ;;  %v1717_v59 = vld [vmem:[#allocation10 + $0x38] sm:$0xff]  }
  0xb3   :  { %1446 = vmatprep.subr.bf16.mxu1 %v1696_v60  ;;  %v1409_v60 = vld [vmem:[%s2052_s6] ss:$0 sm:$0xff]  ;;  %s1879_s6 = smov [#allocation11]  }
  0xb5   :  { %807 = vmatpush1.bf16.msra.mxu0 %v1632_v31 }
  0xb6   :  { %808 = vmatprep.subr.bf16.mxu0 %v1640_v33  ;;  %1447 = vmatpush3.bf16.msra.mxu1 %v1697_v61  ;;  %v1703_v33 = vld [vmem:[#allocation8 + $0x8] sm:$0xff]  }
  0xb7   :  { %1448 = vmatprep.subr.bf16.mxu1 %v1698_v62 }
  0xb9   :  { %809 = vmatpush1.bf16.msra.mxu0 %v1638_v35  ;;  %v1705_v35 = vld [vmem:[#allocation8 + $0x18] sm:$0xff]  }
  0xba   :  { %810 = vmatprep.subr.bf16.mxu0 %v1646_v37  ;;  %1449 = vmatpush3.bf16.msra.mxu1 %v1699_v63  ;;  %v1707_v37 = vld [vmem:[#allocation8 + $0x28] sm:$0xff]  }
  0xbb   :  { %1450 = vmatprep.subr.bf16.mxu1 %v1700_v0 }
  0xbd   :  { %811 = vmatpush1.bf16.msra.mxu0 %v1644_v39  ;;  %v1709_v39 = vld [vmem:[#allocation8 + $0x38] sm:$0xff]  }
  0xbe   :  { %812 = vmatprep.subr.bf16.mxu0 %v1652_v41  ;;  %1451 = vmatpush3.bf16.msra.mxu1 %v1701_v1  ;;  %v1392_v41 = vld [vmem:[%s2050_s4] ss:$0 sm:$0xff] }
  0xbf   :  { %1476 = vmatprep.subr.bf16.mxu1 %v1877_v2 }
  0xc1   :  { %813 = vmatpush1.bf16.msra.mxu0 %v1650_v42 }
  0xc2   :  { %814 = vmatprep.subr.bf16.mxu0 %v1658_v43 }
  0xc5   :  { %815 = vmatpush1.bf16.msra.mxu0 %v1656_v44 }
  0xc6   :  { %816 = vmatprep.subr.bf16.mxu0 %v1664_v45 }
  0xc9   :  { %817 = vmatpush1.bf16.msra.mxu0 %v1662_v46 }
  0xca   :  { %818 = vmatprep.subr.bf16.mxu0 %v1670_v47 }
  0xcd   :  { %819 = vmatpush1.bf16.msra.mxu0 %v1668_v48 }
  0xce   :  { %820 = vmatprep.subr.bf16.mxu0 %v1676_v49 }
  0xd1   :  { %821 = vmatpush1.bf16.msra.mxu0 %v1674_v50 }
  0xd2   :  { %822 = vmatprep.subr.bf16.mxu0 %v1682_v51  ;;  %v1710_v51 = vld [vmem:[#allocation10] sm:$0xff]  }
  0xd5   :  { %823 = vmatpush1.bf16.msra.mxu0 %v1680_v52 }
  0xd6   :  { %824 = vmatprep.subr.bf16.mxu0 %v1685_v53  ;;  %v1711_v53 = vld [vmem:[#allocation10 + $0x8] sm:$0xff]  }
  0xd9   :  { %825 = vmatpush1.bf16.msra.mxu0 %v1683_v54  ;;  %v1712_v54 = vld [vmem:[#allocation10 + $0x10] sm:$0xff]  }
  0xdc   :  { %827 = vmatmul.mubr.bf16.vlgmr.msra.gmra.mrb[0].mxu0 %v118_v57  ;;  %v1715_v57 = vld [vmem:[#allocation10 + $0x28] sm:$0xff]  }
 0x174   :  { %v742_v3 = vpop.f32.mrb[0].mxu1 }
 0x175   :  { %v744_v4 = vpop.f32.mrb[1].mxu1  ;;  %v743_v14 = vadd.f32 %v742_v3, %v221_v12 }
 0x176   :  { %v746_v5 = vpop.f32.mrb[2].mxu1  ;;  %v745_v15 = vadd.f32 %v744_v4, %v225_v13 }
 0x177   :  { %v748_v6 = vpop.f32.mrb[3].mxu1  ;;  %v747_v17 = vadd.f32 %v746_v5, %v221_v12 }
 0x178   :  { %v749_v20 = vadd.f32 %v748_v6, %v225_v13 }
 0x1af   :  { %v828_v16 = vpop.f32.mrb[0].mxu0 }
 0x1b0   :  { %v1517_v18 = vadd.f32 %v828_v16, %v743_v14  ;;  %v830_v19 = vpop.f32.mrb[1].mxu0 }
 0x1b1   :  { %v1519_v21 = vadd.f32 %v830_v19, %v745_v15  ;;  %v832_v22 = vpop.f32.mrb[2].mxu0 }
 0x1b2   :  { %v1521_v23 = vadd.f32 %v832_v22, %v747_v17  ;;  %v834_v24 = vpop.f32.mrb[3].mxu0  ;;  %v837_v26 = vmax.f32 %v1517_v18, 0.0 }
 0x1b3   :  { %v1523_v25 = vadd.f32 %v834_v24, %v749_v20  ;;  %v838_v28 = vmax.f32 %v1519_v21, 0.0 }
 0x1b4   :  { %v839_v27 = vmax.f32 %v1521_v23, 0.0 }
 0x1b5   :  { %v840_v29 = vmax.f32 %v1523_v25, 0.0 }
 0x1b6   :  { %v841_v30 = vpack.c.bf16 %v839_v27, %v837_v26 }
 0x1b7   :  { %v842_v31 = vpack.c.bf16 %v840_v29, %v838_v28 }
 0x1b9   :  { %1010 = vmatprep.mubr.bf16.mxu1 %v842_v31 }
 0x1ba   :  { %1011 = vmatmul.mubr.bf16.vlgmr.msra.gmra.mrb[4].mxu1 %v841_v30 }
 0x1bb   :  { %1477 = vmatpush3.bf16.msra.mxu1 %v1702_v32  ;;  %1492 = vmatprep.mubr.msk.bf16.mxu1 %vm1878_vm0, %v1877_v2 }
 0x1bc   :  { %1478 = vmatprep.subr.bf16.mxu1 %v1877_v2 }
 0x1bf   :  { %1479 = vmatpush3.bf16.msra.mxu1 %v1703_v33 }
 0x1c0   :  { %1480 = vmatprep.subr.bf16.mxu1 %v1877_v2 }
 0x1c3   :  { %1481 = vmatpush3.bf16.msra.mxu1 %v1704_v34 }
 0x1c4   :  { %1482 = vmatprep.subr.bf16.mxu1 %v1877_v2 }
 0x1c7   :  { %1483 = vmatpush3.bf16.msra.mxu1 %v1705_v35 }
 0x1c8   :  { %1484 = vmatprep.subr.bf16.mxu1 %v1877_v2 }
 0x1cb   :  { %1485 = vmatpush3.bf16.msra.mxu1 %v1706_v36 }
 0x1cc   :  { %1486 = vmatprep.subr.bf16.mxu1 %v1877_v2 }
 0x1cf   :  { %1487 = vmatpush3.bf16.msra.mxu1 %v1707_v37 }
 0x1d0   :  { %1488 = vmatprep.subr.bf16.mxu1 %v1877_v2 }
 0x1d3   :  { %1489 = vmatpush3.bf16.msra.mxu1 %v1708_v38 }
 0x1d4   :  { %1490 = vmatprep.subr.bf16.mxu1 %v1877_v2 }
 0x1d7   :  { %1491 = vmatpush3.bf16.msra.mxu1 %v1709_v39 }
 0x1d8   :  { %1496 = vmatprep.subr.bf16.mxu1 %v1877_v2 }
 0x28d   :  { %v1452_v40 = vpop.f32.mrb[4].mxu1 }
 0x28e   :  { %v1453_v42 = vpop.f32.mrb[5].mxu1 }
 0x28f   :  { %v1454_v43 = vadd.f32 %v1453_v42, %v1452_v40  ;;  %v1455_v44 = vpop.f32.mrb[6].mxu1 }
 0x290   :  { %v1456_v45 = vpop.f32.mrb[7].mxu1 }
 0x291   :  { %v1013_v46 = vadd.f32 %v1454_v43, %v1392_v41  ;;  %v1457_v47 = vadd.f32 %v1456_v45, %v1455_v44 }
 0x293   :  { %v1016_v48 = vadd.f32 %v1457_v47, %v1392_v41  ;;  %v1019_v49 = vmax.f32 %v1013_v46, 0.0 }
 0x295   :  { %v1020_v50 = vmax.f32 %v1016_v48, 0.0 }
 0x297   :  { %v1021_v52 = vpack.c.bf16 %v1020_v50, %v1019_v49 }
 0x299   :  { %1493 = vmatmul.mubr.bf16.vlgmr.msra.gmra.mrb[8].mxu1 %v1021_v52 }
 0x29a   :  { %1497 = vmatpush3.bf16.msra.mxu1 %v1710_v51  ;;  %1512 = vmatprep.mubr.msk.bf16.mxu1 %vm1878_vm0, %v1877_v2 }
 0x29b   :  { %1498 = vmatprep.subr.bf16.mxu1 %v1877_v2 }
 0x29e   :  { %1499 = vmatpush3.bf16.msra.mxu1 %v1711_v53 }
 0x29f   :  { %1500 = vmatprep.subr.bf16.mxu1 %v1877_v2 }
 0x2a2   :  { %1501 = vmatpush3.bf16.msra.mxu1 %v1712_v54 }
 0x2a3   :  { %1502 = vmatprep.subr.bf16.mxu1 %v1877_v2 }
 0x2a6   :  { %1503 = vmatpush3.bf16.msra.mxu1 %v1713_v55 }
 0x2a7   :  { %1504 = vmatprep.subr.bf16.mxu1 %v1877_v2 }
 0x2aa   :  { %1505 = vmatpush3.bf16.msra.mxu1 %v1714_v56 }
 0x2ab   :  { %1506 = vmatprep.subr.bf16.mxu1 %v1877_v2 }
 0x2ae   :  { %1507 = vmatpush3.bf16.msra.mxu1 %v1715_v57 }
 0x2af   :  { %1508 = vmatprep.subr.bf16.mxu1 %v1877_v2 }
 0x2b2   :  { %1509 = vmatpush3.bf16.msra.mxu1 %v1716_v58 }
 0x2b3   :  { %1510 = vmatprep.subr.bf16.mxu1 %v1877_v2  ;;  %v1418_v2 = vld [vmem:[%s2054_s8] ss:$0 sm:$0xff]  ;;  %s1282_s8 = sshll.u32 %s1879_s6, 4  ;;  %s1283_s8 = int_to_ptr.vmem [resolvable:$true] %s1282_s8 }
 0x2b4   :  { %s1836_s15 = scalar_lea.vmem %s1283_s8, 128  ;;  %p1841_p13 = scmp.lt.s32.totalorder %s1283_s8, %s1283_s8 }
 0x2b5   :  { %p1837_p12 = scmp.ne.s32.totalorder %s1283_s8, %s1836_s15  ;;  %p1842_p0 = scmp.lt.s32.totalorder %s1836_s15, %s1836_s15 }
 0x2b6   :  { %1511 = vmatpush3.bf16.msra.mxu1 %v1717_v59 }
 0x2b7   :  { %p1843_p1 = por %p1842_p0, %p1841_p13 }
 0x2b9   :  { %p1844_p2 = pnand %p1843_p1, %p1837_p12 }
 0x36c   :  { %v1127_v61 = vpop.f32.mrb[8].mxu1 }
 0x36d   :  { %v1128_v62 = vadd.f32 %v1409_v60, %v1127_v61  ;;  %v1494_v63 = vpop.f32.mrb[9].mxu1 }
 0x36e   :  { %v1130_v0 = vpop.f32.mrb[10].mxu1 }
 0x36f   :  { %v1131_v1 = vadd.f32 %v1409_v60, %v1130_v0  ;;  %v1495_v3 = vpop.f32.mrb[11].mxu1  ;;  %v1134_v4 = vmax.f32 %v1128_v62, 0.0 }
 0x371   :  { %v1135_v5 = vmax.f32 %v1131_v1, 0.0 }
 0x373   :  { %v1136_v6 = vpack.c.bf16 %v1135_v5, %v1134_v4 }
 0x375   :  { %1513 = vmatmul.mubr.bf16.vlgmr.msra.gmra.mrb[12].mxu1 %v1136_v6 }
 0x448   :  { %v1242_v7 = vpop.f32.mrb[12].mxu1 }
 0x449   :  { %v1243_v8 = vadd.f32 %v1418_v2, %v1242_v7  ;;  %v1514_v9 = vpop.f32.mrb[13].mxu1 }
 0x44a   :  { %v1245_v10 = vpop.f32.mrb[14].mxu1 }
 0x44b   :  { %1249 = vmax.xlane.f32.xlu0 %v1243_v8  ;;  %v1515_v11 = vpop.f32.mrb[15].mxu1  ;;  %v1246_v12 = vadd.f32 %v1418_v2, %v1245_v10 }
 0x44f   :  { %1251 = vmax.xlane.f32.xlu0 %v1246_v12 }
 0x4d8   :  { %v1250_v13 = vpop.xlane.xlu0 %1249 }
 0x4d9   :  { %v1253_v14 = vsub.f32 %v1243_v8, %v1250_v13 }
 0x4db   :  { %v1255_v15 = vmul.f32 1.442695, %v1253_v14 }
 0x4dc   :  { %v1252_v16 = vpop.xlane.xlu0 %1251 }
 0x4dd   :  { %1718 = vpow2.f32 %v1255_v15  ;;  %v1254_v17 = vsub.f32 %v1246_v12, %v1252_v16 }
 0x4df   :  { %v1257_v18 = vmul.f32 1.442695, %v1254_v17 }
 0x4e1   :  { %1720 = vpow2.f32 %v1257_v18 }
 0x4e7   :  { %v1719_v19 = vpop.eup %1718 }
 0x4e8   :  { %1259 = vadd.xlane.f32.xlu1 %v1719_v19 }
 0x4eb   :  { %v1721_v20 = vpop.eup %1720 }
 0x4ec   :  { %1261 = vadd.xlane.f32.xlu1 %v1721_v20 }
 0x575   :  { %v1260_v21 = vpop.xlane.xlu1 %1259 }
 0x576   :  { %1722 = vrcp.f32 %v1260_v21 }
 0x579   :  { %v1262_v22 = vpop.xlane.xlu1 %1261 }
 0x57a   :  { %1724 = vrcp.f32 %v1262_v22 }
 0x580   :  { %v1723_v23 = vpop.eup %1722 }
 0x581   :  { %v1265_v25 = vmul.f32 %v1723_v23, %v1719_v19 }
 0x584   :  { %v1725_v24 = vpop.eup %1724 }
 0x585   :  { %v1266_v26 = vmul.f32 %v1725_v24, %v1721_v20 }
 0x587   :  { %v1434_v27 = vpack.c.bf16 %v1266_v26, %v1265_v25 }
 0x589   :  { %1435 = vst [vmem:[#allocation11] sm:$0xff] %v1434_v27  }
 0x58a   :  { %1847 = shalt.err (!%p1844_p2)
}
 0x58b   :  { %s1848_s18 = scalar_lea.hbm %s2055_s9, 128 }
 0x58c   :  { %p1849_p3 = scmp.ne.s32.totalorder %s2055_s9, %s1848_s18  ;;  %p1852_p4 = scmp.lt.u32.totalorder %s1848_s18, %s2055_s9 }
 0x58e   :  { %p1854_p5 = pnand %p1852_p4, %p1849_p3 }
 0x590   :  { %1857 = shalt.err (!%p1854_p5)
}
 0x591   :  { %1288 = dma.vmem_to_hbm [thread:$0]  %s1283_s8, 128, %s2055_s9, [#allocation4], %s1871_s10, %s1871_s10, %s1872_s14  }
 0x592   :  { %1864 = dma.done.wait [#allocation4], 128  }
 0x593   :  { %1865 = vsyncadd [#allocation4], 4294967168 }
 0x594   :  { %1292 = vsyncpa [#allocation3], 1 }
 0x595   :  { %1293 = vsyncpa [#allocation6], 1 }
 0x596   :  { %1294 = vsyncpa [#allocation9], 1 }
 0x597   :  { %1295 = vsyncpa [#allocation4], 1 }

</bundles_post_ra>
